<compile_context>
chip_gen: v7x
topology: tpu7x:2x2x1
jax: 0.10.0
libtpu: 0.0.40
codegen_flags: <defaults>
</compile_context>

<pallas_src>
import math
import functools
import jax
import jax.numpy as jnp
from jax import lax
from jax.experimental import pallas as pl
from jax.experimental.pallas import tpu as pltpu

_MIB = 1024 * 1024


def _round_up(n, m):
    return ((n + m - 1) // m) * m


@functools.lru_cache(maxsize=None)
def _vmem_limit_bytes():
    """Chip-aware scoped-VMEM budget: ~100 MiB on 128-MiB chips, ~48 MiB on v7x."""
    try:
        cap = pltpu.get_tpu_info().vmem_capacity_bytes
    except Exception:   # info query unavailable -> conservative default
        cap = 64 * _MIB
    return int(min(100 * _MIB, max(32 * _MIB, cap - 16 * _MIB)))


def _pick_n_tile(n):
    """Largest of {512,256,128} dividing n (keeps MXU fed, lane-aligned), else full n."""
    for c in (512, 256, 128):
        if n % c == 0:
            return c
    return n


# ------------------------- Hoisted input projection ---------------------------
def _input_proj_kernel(x_ref, wt_ref, b_ref, o_ref):
    # (tm, E) bf16 @ (E, tn) bf16 -> f32 accumulate, + f32 bias, stored bf16.
    o_ref[...] = (
        jnp.dot(x_ref[...], wt_ref[...], preferred_element_type=jnp.float32)
        + b_ref[...]
    ).astype(o_ref.dtype)


def input_projection(x_tbe, w_ih, b_ih, b_hh):
    """(T,B,E) -> (T,B,4H) bf16 = x @ W_ih^T + (b_ih + b_hh), over all T*B rows."""
    T, B, E = x_tbe.shape
    H4 = w_ih.shape[0]
    M = T * B

    x2d = x_tbe.reshape(M, E).astype(jnp.bfloat16)
    w_t = jnp.transpose(w_ih).astype(jnp.bfloat16)            # (E, 4H), transposed once
    bias = (b_ih + b_hh).reshape(1, H4).astype(jnp.float32)

    tm = min(512, _round_up(M, 8))                            # 8-sublane aligned M tile
    Mp = _round_up(M, tm)
    if Mp != M:
        x2d = jnp.pad(x2d, ((0, Mp - M), (0, 0)))             # padded rows sliced off below
    tn = _pick_n_tile(H4)                                     # VMEM use independent of H
    # TODO(synk): also K-tile over E with an f32 VMEM accumulator for very large E.

    out = pl.pallas_call(
        _input_proj_kernel,
        out_shape=jax.ShapeDtypeStruct((Mp, H4), jnp.bfloat16),
        grid_spec=pltpu.PrefetchScalarGridSpec(
            num_scalar_prefetch=0,
            grid=(Mp // tm, H4 // tn),
            in_specs=[
                pl.BlockSpec((tm, E), lambda i, j: (i, 0)),   # reused across j (no refetch)
                pl.BlockSpec((E, tn), lambda i, j: (0, j)),
                pl.BlockSpec((1, tn), lambda i, j: (0, j)),
            ],
            out_specs=pl.BlockSpec((tm, tn), lambda i, j: (i, j)),
        ),
        compiler_params=pltpu.CompilerParams(
            dimension_semantics=("parallel", "parallel"),
            vmem_limit_bytes=_vmem_limit_bytes(),
        ),
    )(x2d, w_t, bias)
    return out[:M].reshape(T, B, H4)


# --------------------------- Recurrent LSTM kernel -----------------------------
def _lstm_recurrent_kernel(gx_ref, whht_ref, out_ref, h_scr, c_scr, *,
                           chunk, hidden, seq_len, return_all, masked):
    """One grid step == `chunk` timesteps for one batch shard.

    gx_ref:   (chunk, Bt, 4H) bf16  precomputed x-projection gates (incl. biases)
    whht_ref: (H, 4H)         bf16  W_hh^T (pre-transposed, constant over the grid)
    out_ref:  (chunk, Bt, H)  bf16  all hidden states      (return_all=True)
              (Bt, H)         f32   last hidden state only (return_all=False)
    h_scr/c_scr: (Bt, H) f32  carries across grid steps
    """
    H = hidden

    @pl.when(pl.program_id(1) == 0)          # first time-chunk of this batch shard
    def _():
        h_scr[...] = jnp.zeros_like(h_scr)
        c_scr[...] = jnp.zeros_like(c_scr)

    whh_t = whht_ref[...]                    # load once, reused every timestep

    def step(t, carry):
        h, c = carry
        gates = gx_ref[t].astype(jnp.float32) + jnp.dot(
            h.astype(jnp.bfloat16), whh_t, preferred_element_type=jnp.float32)  # (Bt,4H)
        i_g = jax.nn.sigmoid(gates[:, 0 * H:1 * H])
        f_g = jax.nn.sigmoid(gates[:, 1 * H:2 * H])
        g_g = jnp.tanh(gates[:, 2 * H:3 * H])
        o_g = jax.nn.sigmoid(gates[:, 3 * H:4 * H])
        c_new = f_g * c + i_g * g_g
        h_new = o_g * jnp.tanh(c_new)
        if masked:
            # Tail of a padded sequence: keep the last valid h/c untouched.
            valid = (pl.program_id(1) * chunk + t) < seq_len
            h_new = jnp.where(valid, h_new, h)
            c_new = jnp.where(valid, c_new, c)
        if return_all:
            out_ref[t] = h_new.astype(out_ref.dtype)
        return h_new, c_new

    h, c = lax.fori_loop(0, chunk, step, (h_scr[...], c_scr[...]), unroll=True)
    h_scr[...] = h
    c_scr[...] = c
    if not return_all:
        out_ref[...] = h.astype(out_ref.dtype)   # constant-index block: last write wins


def _recurrence_call(gates_x, whh_t, *, T, H, chunk, Bt, nb, return_all,
                     single_buffer_weights):
    Tp, B, H4 = gates_x.shape
    nt = Tp // chunk
    masked = (Tp != T)

    if single_buffer_weights:
        # Constant index_map -> fetched once; single-buffer halves its VMEM footprint
        # (important at production H, e.g. H=2048 -> 16 MiB instead of 32 MiB).
        whh_spec = pl.BlockSpec((H, H4), lambda b, t: (0, 0),
                                pipeline_mode=pl.Buffered(1))
    else:
        whh_spec = pl.BlockSpec((H, H4), lambda b, t: (0, 0))

    kernel = functools.partial(_lstm_recurrent_kernel, chunk=chunk, hidden=H,
                               seq_len=T, return_all=return_all, masked=masked)

    if return_all:
        out_shape = jax.ShapeDtypeStruct((Tp, B, H), jnp.bfloat16)
        out_spec = pl.BlockSpec((chunk, Bt, H), lambda b, t: (t, b, 0))
    else:
        out_shape = jax.ShapeDtypeStruct((B, H), jnp.float32)
        out_spec = pl.BlockSpec((Bt, H), lambda b, t: (b, 0))

    return pl.pallas_call(
        kernel,
        out_shape=out_shape,
        grid_spec=pltpu.PrefetchScalarGridSpec(
            num_scalar_prefetch=0,
            grid=(nb, nt),
            in_specs=[
                pl.BlockSpec((chunk, Bt, H4), lambda b, t: (t, b, 0)),
                whh_spec,
            ],
            out_specs=out_spec,
            scratch_shapes=[
                pltpu.VMEM((Bt, H), jnp.float32),   # h carry
                pltpu.VMEM((Bt, H), jnp.float32),   # c carry
            ],
        ),
        compiler_params=pltpu.CompilerParams(
            # Time axis MUST stay "arbitrary" (sequential): h/c are carried in scratch
            # and the return_all=False output relies on last-write-wins.
            dimension_semantics=("parallel", "arbitrary"),
            vmem_limit_bytes=_vmem_limit_bytes(),
        ),
    )(gates_x, whh_t)


def lstm_layer(x_tbe, w_ih, w_hh, b_ih, b_hh, *, return_all=True,
               max_chunk=32, batch_shards=1):
    """x_tbe: (T,B,E) -> (T,B,H) bf16 (return_all) or (B,H) f32 (last step only)."""
    T, B, _ = x_tbe.shape
    H4 = w_ih.shape[0]
    H = H4 // 4

    chunk = min(max_chunk, T)
    Tp = _round_up(T, chunk)
    if Tp != T:
        # Pad time so the chunk stays large for odd/prime T; tail steps are masked
        # inside the kernel so padded gates never corrupt h/c.
        x_tbe = jnp.pad(x_tbe, ((0, Tp - T), (0, 0), (0, 0)))

    # Hoisted, MXU-friendly input projection (includes both biases), streamed bf16.
    gates_x = input_projection(x_tbe, w_ih, b_ih, b_hh)        # (Tp, B, 4H) bf16
    whh_t = jnp.transpose(w_hh).astype(jnp.bfloat16)           # (H, 4H), transposed once

    assert B % batch_shards == 0
    Bt = B // batch_shards
    assert Bt == B or Bt % 8 == 0, "batch shard must be full B or a multiple of 8"

    call = functools.partial(_recurrence_call, gates_x, whh_t, T=T, H=H,
                             chunk=chunk, Bt=Bt, nb=batch_shards,
                             return_all=return_all)
    try:
        out = call(single_buffer_weights=True)
    except Exception:
        # pl.Buffered(1) unsupported by this jax/mosaic build -> default buffering.
        out = call(single_buffer_weights=False)

    if return_all and Tp != T:
        out = out[:T]
    return out
    # TODO(synk): fuse the next layer's x-projection (and the final Linear) into the
    # recurrent kernel's chunk epilogue to remove one (T,B,H) HBM round-trip per layer.


# ------------------------------- Linear kernel --------------------------------
def _linear_kernel(x_ref, wt_ref, b_ref, o_ref):
    o_ref[...] = (
        jnp.dot(x_ref[...], wt_ref[...], preferred_element_type=jnp.float32)
        + b_ref[...]
    ).astype(o_ref.dtype)


def linear(x, w, b):
    """x: (B, H), w: (O, H), b: (O,) -> (B, O).  Output padded to a 128-lane slab."""
    B, H = x.shape
    O = w.shape[0]
    Op = _round_up(O, 128)                                   # lane-dense stores
    w_t = jnp.transpose(w).astype(jnp.bfloat16)              # (H, O), transposed once
    if Op != O:
        w_t = jnp.pad(w_t, ((0, 0), (0, Op - O)))
        b = jnp.pad(b, (0, Op - O))
    out = pl.pallas_call(
        _linear_kernel,
        out_shape=jax.ShapeDtypeStruct((B, Op), jnp.float32),
        in_specs=[
            pl.BlockSpec((B, H), lambda: (0, 0)),
            pl.BlockSpec((H, Op), lambda: (0, 0)),
            pl.BlockSpec((1, Op), lambda: (0, 0)),
        ],
        out_specs=pl.BlockSpec((B, Op), lambda: (0, 0)),
        compiler_params=pltpu.CompilerParams(vmem_limit_bytes=_vmem_limit_bytes()),
    )(x.astype(jnp.bfloat16), w_t, b.reshape(1, Op).astype(jnp.float32))
    return out[:, :O]


# ------------------------------- Full model -----------------------------------
def init_params(key, vocab_len, embed_size, hidden_dim, output_dim, num_layers):
    """Deterministic init mirroring PyTorch shapes/distributions."""
    keys = jax.random.split(key, 2 + 4 * num_layers + 2)
    ki = iter(range(len(keys)))

    params = {}
    params["embed"] = jax.random.normal(keys[next(ki)], (vocab_len, embed_size),
                                        dtype=jnp.float32)
    bound = 1.0 / math.sqrt(hidden_dim)
    layers = []
    for l in range(num_layers):
        in_dim = embed_size if l == 0 else hidden_dim
        w_ih = jax.random.uniform(keys[next(ki)], (4 * hidden_dim, in_dim),
                                  minval=-bound, maxval=bound, dtype=jnp.float32)
        w_hh = jax.random.uniform(keys[next(ki)], (4 * hidden_dim, hidden_dim),
                                  minval=-bound, maxval=bound, dtype=jnp.float32)
        b_ih = jax.random.uniform(keys[next(ki)], (4 * hidden_dim,),
                                  minval=-bound, maxval=bound, dtype=jnp.float32)
        b_hh = jax.random.uniform(keys[next(ki)], (4 * hidden_dim,),
                                  minval=-bound, maxval=bound, dtype=jnp.float32)
        layers.append((w_ih, w_hh, b_ih, b_hh))
    params["lstm"] = layers
    lb = 1.0 / math.sqrt(hidden_dim)
    params["w_out"] = jax.random.uniform(keys[next(ki)], (output_dim, hidden_dim),
                                         minval=-lb, maxval=lb, dtype=jnp.float32)
    params["b_out"] = jax.random.uniform(keys[next(ki)], (output_dim,),
                                         minval=-lb, maxval=lb, dtype=jnp.float32)
    return params


def lstm_model_forward(params, tokens, *, batch_shards=1):
    """tokens: (B, T) int32 token ids -> (B, output_dim) logits."""
    # TODO(synk): embedding gather kept in plain JAX glue (jnp.take); a Pallas gather
    # kernel would need per-row manual DMA and is not worth it at these sizes.
    x = jnp.take(params["embed"], tokens.astype(jnp.int32), axis=0)  # (B, T, E)
    x = jnp.transpose(x, (1, 0, 2))                                  # (T, B, E)
    n_layers = len(params["lstm"])
    for li, (w_ih, w_hh, b_ih, b_hh) in enumerate(params["lstm"]):
        last_layer = (li == n_layers - 1)
        # Last layer emits only the final hidden state (== out[:, -1, :]).
        x = lstm_layer(x, w_ih, w_hh, b_ih, b_hh, return_all=not last_layer,
                       batch_shards=batch_shards)
        # nn.LSTM inter-layer dropout is training-only; eval forward skips it.
    return linear(x, params["w_out"], params["b_out"])               # (B, O)


if __name__ == "__main__":
    # Small, forward-consistent shapes
    vocab_len, embed_size, hidden_dim, output_dim, num_layers = 32, 16, 32, 8, 2
    batch, seq = 2, 8

    key = jax.random.PRNGKey(0)
    pkey, dkey = jax.random.split(key)
    params = init_params(pkey, vocab_len, embed_size, hidden_dim, output_dim,
                         num_layers)
    tokens = jax.random.randint(dkey, (batch, seq), 0, vocab_len, dtype=jnp.int32)

    out = lstm_model_forward(params, tokens)
    jax.block_until_ready(out)
    assert out.shape == (batch, output_dim), out.shape
    print("KERNEL_OK")
</pallas_src>

<mosaic_0001>
module attributes {stable_mosaic.version = 11 : i64} {
  func.func @_input_proj_kernel(%arg0: i32, %arg1: i32, %arg2: memref<16x16xbf16, #tpu.memory_space<vmem>>, %arg3: memref<16x128xbf16, #tpu.memory_space<vmem>>, %arg4: memref<1x128xf32, #tpu.memory_space<vmem>>, %arg5: memref<16x128xbf16, #tpu.memory_space<vmem>>) attributes {dimension_semantics = [#tpu.dimension_semantics<parallel>, #tpu.dimension_semantics<parallel>], iteration_bounds = array<i64: 1, 1>, scalar_prefetch = 0 : i64, scratch_operands = 0 : i64, tpu.core_type = #tpu.core_type<tc>, window_params = [{transform_indices = @transform_0, window_bounds = array<i64: 16, 16>}, {transform_indices = @transform_1, window_bounds = array<i64: 16, 128>}, {transform_indices = @transform_2, window_bounds = array<i64: 1, 128>}, {transform_indices = @transform_3, window_bounds = array<i64: 16, 128>}]} {
    %c0 = arith.constant 0 : index
    %c0_0 = arith.constant 0 : index
    %0 = vector.load %arg2[%c0, %c0_0] : memref<16x16xbf16, #tpu.memory_space<vmem>>, vector<16x16xbf16>
    %c0_1 = arith.constant 0 : index
    %c0_2 = arith.constant 0 : index
    %1 = vector.load %arg3[%c0_1, %c0_2] : memref<16x128xbf16, #tpu.memory_space<vmem>>, vector<16x128xbf16>
    %cst = arith.constant dense<0.000000e+00> : vector<16x128xf32>
    %2 = tpu.matmul %0, %1, %cst {dimension_numbers = #tpu.dot_dimension_numbers<[1], [0], [0], [1], [0, 0, 1, 1], [], []>} : vector<16x16xbf16>, vector<16x128xbf16>, vector<16x128xf32> -> vector<16x128xf32>
    %c0_3 = arith.constant 0 : index
    %c0_4 = arith.constant 0 : index
    %3 = vector.load %arg4[%c0_3, %c0_4] : memref<1x128xf32, #tpu.memory_space<vmem>>, vector<1x128xf32>
    %4 = vector.broadcast %3 : vector<1x128xf32> to vector<16x128xf32>
    %5 = arith.addf %2, %4 : vector<16x128xf32>
    %6 = arith.truncf %5 : vector<16x128xf32> to vector<16x128xbf16>
    %c0_5 = arith.constant 0 : index
    %c0_6 = arith.constant 0 : index
    %7 = vector.load %arg5[%c0_5, %c0_6] : memref<16x128xbf16, #tpu.memory_space<vmem>>, vector<16x128xbf16>
    tpu.vector_store %arg5[%c0_5, %c0_6], %6 {strides = array<i32>} : memref<16x128xbf16, #tpu.memory_space<vmem>>, vector<16x128xbf16>,
    return
  }
  func.func @transform_0(%arg0: i32, %arg1: i32) -> (i32, i32) {
    %c0_i32 = arith.constant 0 : i32
    %c0_i32_0 = arith.constant 0 : i32
    return %arg0, %c0_i32 : i32, i32
  }
  func.func @transform_1(%arg0: i32, %arg1: i32) -> (i32, i32) {
    %c0_i32 = arith.constant 0 : i32
    %c0_i32_0 = arith.constant 0 : i32
    return %c0_i32, %arg1 : i32, i32
  }
  func.func @transform_2(%arg0: i32, %arg1: i32) -> (i32, i32) {
    %c0_i32 = arith.constant 0 : i32
    %c0_i32_0 = arith.constant 0 : i32
    return %c0_i32, %arg1 : i32, i32
  }
  func.func @transform_3(%arg0: i32, %arg1: i32) -> (i32, i32) {
    %c0_i32 = arith.constant 0 : i32
    return %arg0, %arg1 : i32, i32
  }
}

</mosaic_0001>

<bundles_post_ra>
// kernel: tpu_custom_call.1
= control target key start
LH: loop header
LB: loop body
LE: loop exit
PB: predicated region body
PF: predicated region fallthrough
CT: control target
= control target key end

     0   :  { %8 = vsyncpa [#allocation3], 0  ;;  %s316_s0 = inlined_call_operand.hbm [shape: bf16[16,16], index: 0, kind: input, shape index: {}]   ;;  %s317_s1 = inlined_call_operand.hbm [shape: bf16[16,128], index: 1, kind: input, shape index: {}]   ;;  %s318_s2 = inlined_call_operand.vmem [shape: f32[1,128], index: 2, kind: input, shape index: {}]   ;;  %s319_s3 = inlined_call_operand.hbm [shape: bf16[16,128], index: 3, kind: output, shape index: {}]  }
   0x1   :  { %9 = vsyncpa [#allocation6], 0 }
   0x2   :  { %10 = vsyncpa [#allocation4], 0  ;;  %s241_s12 = smov [#allocation2]   ;;  %s169_s16 = scalar_lea.hbm %s316_s0, 128 }
   0x3   :  { %s16_s13 = sshll.u32 %s241_s12, 4  ;;  %p170_p0 = scmp.ne.s32.totalorder %s316_s0, %s169_s16  ;;  %s17_s13 = int_to_ptr.vmem [resolvable:$true] %s16_s13 }
   0x4   :  { %p173_p1 = scmp.lt.u32.totalorder %s169_s16, %s316_s0 }
   0x6   :  { %p175_p2 = pnand %p173_p1, %p170_p0 }
   0x8   :  { %178 = shalt.err (!%p175_p2)
}
   0x9   :  { %s179_s21 = scalar_lea.vmem %s17_s13, 128  ;;  %p184_p4 = scmp.lt.s32.totalorder %s17_s13, %s17_s13 }
   0xa   :  { %p180_p3 = scmp.ne.s32.totalorder %s17_s13, %s179_s21  ;;  %p185_p5 = scmp.lt.s32.totalorder %s179_s21, %s179_s21 }
   0xc   :  { %p186_p6 = por %p185_p5, %p184_p4 }
   0xe   :  { %p187_p7 = pnand %p186_p6, %p180_p3 }
  0x10   :  { %190 = shalt.err (!%p187_p7)
}
  0x11   :  { %s242_s22 = smov 64   ;;  %s243_s23 = smov 4  }
  0x12   :  { %22 = dma.hbm_to_vmem [thread:$0]  %s316_s0, 128, %s17_s13, [#allocation3], %s242_s22, %s242_s22, %s243_s23  }
  0x13   :  { %s244_s26 = smov [#allocation5]   ;;  %s191_s30 = scalar_lea.hbm %s317_s1, 128 }
  0x14   :  { %s28_s27 = sshll.u32 %s244_s26, 4  ;;  %p192_p8 = scmp.ne.s32.totalorder %s317_s1, %s191_s30  ;;  %s29_s27 = int_to_ptr.vmem [resolvable:$true] %s28_s27 }
  0x15   :  { %p195_p9 = scmp.lt.u32.totalorder %s191_s30, %s317_s1 }
  0x17   :  { %p197_p10 = pnand %p195_p9, %p192_p8 }
  0x19   :  { %200 = shalt.err (!%p197_p10)
}
  0x1a   :  { %s201_s8 = scalar_lea.vmem %s29_s27, 128  ;;  %p206_p12 = scmp.lt.s32.totalorder %s29_s27, %s29_s27 }
  0x1b   :  { %p202_p11 = scmp.ne.s32.totalorder %s29_s27, %s201_s8  ;;  %p207_p13 = scmp.lt.s32.totalorder %s201_s8, %s201_s8 }
  0x1d   :  { %p208_p0 = por %p207_p13, %p206_p12 }
  0x1f   :  { %p209_p1 = pnand %p208_p0, %p202_p11 }
  0x21   :  { %212 = shalt.err (!%p209_p1)
}
  0x22   :  { %34 = dma.hbm_to_vmem [thread:$0]  %s317_s1, 128, %s29_s27, [#allocation6], %s242_s22, %s242_s22, %s243_s23  }
  0x23   :  { %235 = dma.done.wait [#allocation3], 128  }
  0x24   :  { %236 = vsyncadd [#allocation3], 4294967168 }
  0x25   :  { %237 = dma.done.wait [#allocation6], 128  }
  0x26   :  { %238 = vsyncadd [#allocation6], 4294967168  ;;  %v245_v0 = vmov 0.0   ;;  %vm246_vm0 = vmmov 0   ;;  %v167_v1 = vld [vmem:[#allocation5] sm:$0xff]   ;;  %v168_v2 = vld [vmem:[#allocation2] sm:$0xff]  }
  0x27   :  { %154 = vmatprep.subr.bf16.mxu0 %v245_v0  ;;  %156 = vmatprep.mubr.msk.bf16.mxu0 %vm246_vm0, %v245_v0  ;;  %vm66_vm1 = vcmask 130048   ;;  %v139_v3 = vld [vmem:[%s318_s2] ss:$0 sm:$0xff]  ;;  %s247_s1 = smov [#allocation7]  }
  0x28   :  { %155 = vmatpush3.bf16.msra.mxu0 %v167_v1  ;;  %s126_s12 = sshll.u32 %s247_s1, 4  ;;  %s127_s12 = int_to_ptr.vmem [resolvable:$true] %s126_s12 }
  0x29   :  { %s213_s13 = scalar_lea.vmem %s127_s12, 128  ;;  %p218_p3 = scmp.lt.s32.totalorder %s127_s12, %s127_s12 }
  0x2a   :  { %p214_p2 = scmp.ne.s32.totalorder %s127_s12, %s213_s13  ;;  %p219_p4 = scmp.lt.s32.totalorder %s213_s13, %s213_s13 }
  0x2b   :  { %157 = vmatmul.mubr.msk.bf16.vlgmr.msra.gmra.mrb[0].mxu0 %vm66_vm1, %v168_v2 }
  0x2c   :  { %p220_p5 = por %p219_p4, %p218_p3 }
  0x2e   :  { %p221_p6 = pnand %p220_p5, %p214_p2 }
  0xfe   :  { %v104_v4 = vpop.f32.mrb[0].mxu0 }
  0xff   :  { %v158_v5 = vpop.f32.mrb[1].mxu0  ;;  %v105_v7 = vadd.f32 %v139_v3, %v104_v4 }
 0x100   :  { %v107_v6 = vpop.f32.mrb[2].mxu0 }
 0x101   :  { %v108_v8 = vadd.f32 %v139_v3, %v107_v6  ;;  %v159_v9 = vpop.f32.mrb[3].mxu0 }
 0x103   :  { %v150_v10 = vpack.c.bf16 %v108_v8, %v105_v7 }
 0x105   :  { %151 = vst [vmem:[#allocation7] sm:$0xff] %v150_v10  }
 0x106   :  { %224 = shalt.err (!%p221_p6)
}
 0x107   :  { %s225_s15 = scalar_lea.hbm %s319_s3, 128 }
 0x108   :  { %p226_p7 = scmp.ne.s32.totalorder %s319_s3, %s225_s15  ;;  %p229_p8 = scmp.lt.u32.totalorder %s225_s15, %s319_s3 }
 0x10a   :  { %p231_p9 = pnand %p229_p8, %p226_p7 }
 0x10c   :  { %234 = shalt.err (!%p231_p9)
}
 0x10d   :  { %132 = dma.vmem_to_hbm [thread:$0]  %s127_s12, 128, %s319_s3, [#allocation4], %s242_s22, %s242_s22, %s243_s23  }
 0x10e   :  { %239 = dma.done.wait [#allocation4], 128  }
 0x10f   :  { %240 = vsyncadd [#allocation4], 4294967168 }
 0x110   :  { %136 = vsyncpa [#allocation3], 1 }
 0x111   :  { %137 = vsyncpa [#allocation6], 1 }
 0x112   :  { %138 = vsyncpa [#allocation4], 1 }

</bundles_post_ra>
